<compile_context>
chip_gen: v6e
topology: v6e:2x2x1
jax: 0.10.0
libtpu: 0.0.40
codegen_flags: <defaults>
</compile_context>

<pallas_src>
import functools

import jax
import jax.numpy as jnp
from jax.experimental import pallas as pl
from jax.experimental.pallas import tpu as pltpu


def _round_up(v, m):
    return ((v + m - 1) // m) * m


# ---------------------------------------------------------------------------
# Kernels
# ---------------------------------------------------------------------------
def _invlinear_mean_kernel(x_ref, wg_t_ref, bg_ref, wl_t_ref, bl_ref, o_ref,
                           *, out_features, dim):
    f32 = jnp.float32
    # Gamma linear + LeakyReLU(0.1).  x stays in its storage dtype (bf16/f32);
    # the MXU accumulates in f32.  wg_t is pre-transposed in the wrapper.
    alpha = jnp.dot(x_ref[...], wg_t_ref[...], preferred_element_type=f32)
    alpha = alpha + bg_ref[...]
    alpha = jnp.where(alpha >= 0.0, alpha, 0.1 * alpha)       # (tile_n, out_features)

    # Weighted chunk accumulation; out_features is small & static -> unrolled.
    # Slice the VMEM ref directly (no full-tile cast/materialization);
    # accumulate in f32.
    merged = alpha[:, 0:1] * x_ref[:, 0:dim].astype(f32)
    for i in range(1, out_features):
        merged = merged + alpha[:, i:i + 1] * x_ref[:, i * dim:(i + 1) * dim].astype(f32)

    # Faithful to the PyTorch code (mean_feature = final merged + LAST X chunk),
    # algebraically folded:  merged - (merged + last)/F == merged*(F-1)/F - last/F
    c1 = f32((out_features - 1) / out_features)
    c2 = f32(1.0 / out_features)
    last = x_ref[:, (out_features - 1) * dim:out_features * dim].astype(f32)
    pre = merged * c1 - last * c2

    out = jnp.dot(pre, wl_t_ref[...], preferred_element_type=f32) + bl_ref[...]
    o_ref[...] = out.astype(o_ref.dtype)


def _invlinear_nomean_kernel(x_ref, wg_t_ref, bg_ref, o_ref, *, out_features, dim):
    f32 = jnp.float32
    alpha = jnp.dot(x_ref[...], wg_t_ref[...], preferred_element_type=f32)
    alpha = alpha + bg_ref[...]
    alpha = jnp.where(alpha >= 0.0, alpha, 0.1 * alpha)

    merged = alpha[:, 0:1] * x_ref[:, 0:dim].astype(f32)
    for i in range(1, out_features):
        merged = merged + alpha[:, i:i + 1] * x_ref[:, i * dim:(i + 1) * dim].astype(f32)

    o_ref[...] = merged.astype(o_ref.dtype)


# ---------------------------------------------------------------------------
# Tile / VMEM sizing (generation aware)
# ---------------------------------------------------------------------------
def _select_config(n, in_features, dim, out_features, x_itemsize, out_itemsize):
    try:
        vmem_cap = int(pltpu.get_tpu_info().vmem_capacity_bytes)
    except Exception:
        vmem_cap = 64 * 1024 * 1024              # conservative fallback (v7x-sized)
    small_vmem = vmem_cap <= 64 * 1024 * 1024    # v7x: 64 MiB per TensorCore
    if small_vmem:
        work_budget = 24 * 1024 * 1024           # total per-step residency target
        vmem_limit = 56 * 1024 * 1024
    else:                                        # v5e / v6e: 128 MiB VMEM
        work_budget = 48 * 1024 * 1024
        vmem_limit = 96 * 1024 * 1024

    lane = 128

    def pad(w):
        return _round_up(max(int(w), 1), lane)

    # VMEM bytes needed per batch row:
    #   2x double-buffered X block + 2x double-buffered out block (pipeline)
    #   + lane-padded f32 in-kernel temporaries (alpha, merged chain, pre, out).
    row_bytes = (2 * in_features * x_itemsize
                 + 2 * dim * out_itemsize
                 + (4 * pad(dim) + 2 * pad(out_features)) * 4)
    tile_n = max(8, (work_budget // row_bytes) // 8 * 8)
    tile_n = min(tile_n, _round_up(n, 8))
    # v7x has 2 TensorCores: guarantee >= 2 (roughly balanced) grid steps so the
    # "parallel" annotation actually splits the batch, whenever n allows it.
    if small_vmem and n > 8:
        tile_n = min(tile_n, _round_up((n + 1) // 2, 8))
    return tile_n, vmem_limit


# ---------------------------------------------------------------------------
# Wrappers
# ---------------------------------------------------------------------------
def invlinear_prepare(wg, bg, wl=None, bl=None, *, x_dtype=jnp.float32):
    """One-time weight prep (transpose / reshape / cast).

    Hoisted out of the hot path: call once and reuse the returned params for
    every invlinear_pallas() call.
    """
    wg = jnp.asarray(wg)
    out_features = wg.shape[0]
    params = {
        "wg_t": wg.astype(x_dtype).T,                              # (in_features, out_features)
        "bg": jnp.asarray(bg, jnp.float32).reshape(1, out_features),
    }
    if wl is not None:
        wl = jnp.asarray(wl, jnp.float32)
        dim = wl.shape[0]
        params["wl_t"] = wl.T                                      # (dim, dim)
        params["bl"] = jnp.asarray(bl, jnp.float32).reshape(1, dim)
    return params


def invlinear_pallas(x, params, *, out_features, use_mean=True,
                     tile_n=None, vmem_limit_bytes=None):
    n, in_features = x.shape
    if in_features % out_features != 0:
        raise ValueError(
            f"in_features={in_features} must be divisible by out_features={out_features}")
    dim = in_features // out_features
    out_dtype = x.dtype

    auto_tile, auto_vmem = _select_config(
        n, in_features, dim, out_features,
        x.dtype.itemsize, jnp.dtype(out_dtype).itemsize)
    tile_n = auto_tile if tile_n is None else max(8, _round_up(int(tile_n), 8))
    vmem_limit_bytes = auto_vmem if vmem_limit_bytes is None else int(vmem_limit_bytes)

    # No wrapper-side pad / slice: partial last block is handled by Pallas
    # (out-of-bounds output rows are dropped by the masked writeback).
    grid = (pl.cdiv(n, tile_n),)
    x_spec = pl.BlockSpec((tile_n, in_features), lambda i: (i, 0))
    out_spec = pl.BlockSpec((tile_n, dim), lambda i: (i, 0))

    def resident(arr):
        # Loop-invariant operand: same block every grid step -> fetched once.
        return pl.BlockSpec(arr.shape, lambda i: (0, 0))

    cparams = pltpu.CompilerParams(
        dimension_semantics=("parallel",),       # megacore sharding on v7x
        vmem_limit_bytes=vmem_limit_bytes,
    )

    x_bytes = n * in_features * x.dtype.itemsize
    o_bytes = n * dim * jnp.dtype(out_dtype).itemsize
    flops = 2 * n * in_features * out_features + 2 * n * in_features

    if use_mean:
        wg_t, bg, wl_t, bl = params["wg_t"], params["bg"], params["wl_t"], params["bl"]
        flops += 2 * n * dim * dim + 3 * n * dim
        w_bytes = sum(int(a.size) * a.dtype.itemsize for a in (wg_t, bg, wl_t, bl))
        kernel = functools.partial(_invlinear_mean_kernel,
                                   out_features=out_features, dim=dim)
        return pl.pallas_call(
            kernel,
            out_shape=jax.ShapeDtypeStruct((n, dim), out_dtype),
            grid=grid,
            in_specs=[x_spec, resident(wg_t), resident(bg),
                      resident(wl_t), resident(bl)],
            out_specs=out_spec,
            compiler_params=cparams,
            cost_estimate=pl.CostEstimate(flops=flops, transcendentals=0,
                                          bytes_accessed=x_bytes + o_bytes + w_bytes),
        )(x, wg_t, bg, wl_t, bl)

    # use_mean=False: Lambda weights are never passed / DMA'd.
    wg_t, bg = params["wg_t"], params["bg"]
    w_bytes = sum(int(a.size) * a.dtype.itemsize for a in (wg_t, bg))
    kernel = functools.partial(_invlinear_nomean_kernel,
                               out_features=out_features, dim=dim)
    return pl.pallas_call(
        kernel,
        out_shape=jax.ShapeDtypeStruct((n, dim), out_dtype),
        grid=grid,
        in_specs=[x_spec, resident(wg_t), resident(bg)],
        out_specs=out_spec,
        compiler_params=cparams,
        cost_estimate=pl.CostEstimate(flops=flops, transcendentals=0,
                                      bytes_accessed=x_bytes + o_bytes + w_bytes),
    )(x, wg_t, bg)


def invlinear(x, wg, bg, wl=None, bl=None, *, out_features, use_mean=True, **kw):
    """Convenience one-shot wrapper (prep + kernel)."""
    params = invlinear_prepare(wg, bg, wl, bl, x_dtype=x.dtype)
    return invlinear_pallas(x, params, out_features=out_features,
                            use_mean=use_mean, **kw)


def invlinear_ref(x, wg, bg, wl=None, bl=None, *, out_features, use_mean=True):
    """Pure-JAX reference matching the PyTorch forward exactly."""
    n, in_features = x.shape
    dim = in_features // out_features
    alpha = x @ wg.T + bg.reshape(-1)
    alpha = jnp.where(alpha >= 0, alpha, 0.1 * alpha)
    merged = jnp.zeros((n, dim), jnp.float32)
    mean_feat = jnp.zeros((n, dim), jnp.float32)
    for i in range(out_features):
        merged = merged + alpha[:, i:i + 1] * x[:, i * dim:(i + 1) * dim]
        mean_feat = merged + x[:, i * dim:(i + 1) * dim]
    if use_mean:
        return (merged - mean_feat / out_features) @ wl.T + bl.reshape(-1)
    return merged


if __name__ == "__main__":
    # Small shapes implied by the forward: X is (N, in_features).
    in_features = 32
    out_features = 4
    dim = in_features // out_features          # 8

    key = jax.random.PRNGKey(0)
    kx, kwg, kbg, kwl, kbl, kx2 = jax.random.split(key, 6)

    # nn.Linear(in_features, out_features): weight (out, in), bias (out,)
    wg = jax.random.normal(kwg, (out_features, in_features), jnp.float32) * 0.1
    bg = jax.random.normal(kbg, (out_features,), jnp.float32) * 0.1
    # nn.Linear(dim, dim): weight (dim, dim), bias (dim,)
    wl = jax.random.normal(kwl, (dim, dim), jnp.float32) * 0.1
    bl = jax.random.normal(kbl, (dim,), jnp.float32) * 0.1

    # Weight prep done once (hoisted out of the per-call hot path).
    params_mean = invlinear_prepare(wg, bg, wl, bl, x_dtype=jnp.float32)
    params_nomean = invlinear_prepare(wg, bg, x_dtype=jnp.float32)

    # N=8: aligned case; N=20: exercises the partial (masked) last block — no
    # wrapper pad / slice involved.
    for N, kseed in ((8, kx), (20, kx2)):
        x = jax.random.normal(kseed, (N, in_features), dtype=jnp.float32)

        # use_mean=True path
        y = invlinear_pallas(x, params_mean, out_features=out_features, use_mean=True)
        y = jax.block_until_ready(y)
        y_ref = invlinear_ref(x, wg, bg, wl, bl, out_features=out_features, use_mean=True)
        assert y.shape == (N, dim)
        assert jnp.allclose(y, y_ref, atol=1e-5, rtol=1e-5), (N, y, y_ref)

        # use_mean=False path (Lambda weights never DMA'd)
        y2 = invlinear_pallas(x, params_nomean, out_features=out_features, use_mean=False)
        y2 = jax.block_until_ready(y2)
        y2_ref = invlinear_ref(x, wg, bg, out_features=out_features, use_mean=False)
        assert jnp.allclose(y2, y2_ref, atol=1e-5, rtol=1e-5), (N, y2, y2_ref)

    print("KERNEL_OK")
</pallas_src>

<mosaic_0001>
module attributes {stable_mosaic.version = 11 : i64} {
  func.func @_invlinear_mean_kernel(%arg0: i32, %arg1: memref<8x32xf32, #tpu.memory_space<vmem>>, %arg2: memref<32x4xf32, #tpu.memory_space<vmem>>, %arg3: memref<1x4xf32, #tpu.memory_space<vmem>>, %arg4: memref<8x8xf32, #tpu.memory_space<vmem>>, %arg5: memref<1x8xf32, #tpu.memory_space<vmem>>, %arg6: memref<8x8xf32, #tpu.memory_space<vmem>>) attributes {dimension_semantics = [#tpu.dimension_semantics<parallel>], iteration_bounds = array<i64: 1>, scalar_prefetch = 0 : i64, scratch_operands = 0 : i64, tpu.core_type = #tpu.core_type<tc>, window_params = [{transform_indices = @transform_0, window_bounds = array<i64: 8, 32>}, {pipeline_mode = #tpu.pipeline_mode<synchronous>, transform_indices = @transform_1, window_bounds = array<i64: 32, 4>}, {pipeline_mode = #tpu.pipeline_mode<synchronous>, transform_indices = @transform_2, window_bounds = array<i64: 1, 4>}, {pipeline_mode = #tpu.pipeline_mode<synchronous>, transform_indices = @transform_3, window_bounds = array<i64: 8, 8>}, {pipeline_mode = #tpu.pipeline_mode<synchronous>, transform_indices = @transform_4, window_bounds = array<i64: 1, 8>}, {transform_indices = @transform_5, window_bounds = array<i64: 8, 8>}]} {
    %c0 = arith.constant 0 : index
    %c0_0 = arith.constant 0 : index
    %0 = vector.load %arg1[%c0, %c0_0] : memref<8x32xf32, #tpu.memory_space<vmem>>, vector<8x32xf32>
    %c0_1 = arith.constant 0 : index
    %c0_2 = arith.constant 0 : index
    %1 = vector.load %arg2[%c0_1, %c0_2] : memref<32x4xf32, #tpu.memory_space<vmem>>, vector<32x4xf32>
    %cst = arith.constant dense<0.000000e+00> : vector<8x4xf32>
    %2 = tpu.matmul %0, %1, %cst {dimension_numbers = #tpu.dot_dimension_numbers<[1], [0], [0], [1], [0, 0, 1, 1], [], []>} : vector<8x32xf32>, vector<32x4xf32>, vector<8x4xf32> -> vector<8x4xf32>
    %c0_3 = arith.constant 0 : index
    %c0_4 = arith.constant 0 : index
    %3 = vector.load %arg3[%c0_3, %c0_4] : memref<1x4xf32, #tpu.memory_space<vmem>>, vector<1x4xf32>
    %4 = vector.broadcast %3 : vector<1x4xf32> to vector<8x4xf32>
    %5 = arith.addf %2, %4 : vector<8x4xf32>
    %cst_5 = arith.constant 0.000000e+00 : f32
    %6 = vector.broadcast %cst_5 : f32 to vector<8x4xf32>
    %7 = arith.cmpf oge, %5, %6 : vector<8x4xf32>
    %cst_6 = arith.constant 1.000000e-01 : f32
    %8 = vector.broadcast %cst_6 : f32 to vector<8x4xf32>
    %9 = arith.mulf %8, %5 : vector<8x4xf32>
    %10 = arith.select %7, %5, %9 : vector<8x4xi1>, vector<8x4xf32>
    %11 = vector.extract_strided_slice %10 {offsets = [0, 0], sizes = [8, 1], strides = [1, 1]} : vector<8x4xf32> to vector<8x1xf32>
    %c0_7 = arith.constant 0 : index
    %c0_8 = arith.constant 0 : index
    %12 = vector.load %arg1[%c0_7, %c0_8] : memref<8x32xf32, #tpu.memory_space<vmem>>, vector<8x8xf32>
    %13 = vector.broadcast %11 : vector<8x1xf32> to vector<8x8xf32>
    %14 = arith.mulf %13, %12 : vector<8x8xf32>
    %15 = vector.extract_strided_slice %10 {offsets = [0, 1], sizes = [8, 1], strides = [1, 1]} : vector<8x4xf32> to vector<8x1xf32>
    %c0_9 = arith.constant 0 : index
    %c8 = arith.constant 8 : index
    %16 = vector.load %arg1[%c0_9, %c8] : memref<8x32xf32, #tpu.memory_space<vmem>>, vector<8x8xf32>
    %17 = vector.broadcast %15 : vector<8x1xf32> to vector<8x8xf32>
    %18 = arith.mulf %17, %16 : vector<8x8xf32>
    %19 = arith.addf %14, %18 : vector<8x8xf32>
    %20 = vector.extract_strided_slice %10 {offsets = [0, 2], sizes = [8, 1], strides = [1, 1]} : vector<8x4xf32> to vector<8x1xf32>
    %c0_10 = arith.constant 0 : index
    %c16 = arith.constant 16 : index
    %21 = vector.load %arg1[%c0_10, %c16] : memref<8x32xf32, #tpu.memory_space<vmem>>, vector<8x8xf32>
    %22 = vector.broadcast %20 : vector<8x1xf32> to vector<8x8xf32>
    %23 = arith.mulf %22, %21 : vector<8x8xf32>
    %24 = arith.addf %19, %23 : vector<8x8xf32>
    %25 = vector.extract_strided_slice %10 {offsets = [0, 3], sizes = [8, 1], strides = [1, 1]} : vector<8x4xf32> to vector<8x1xf32>
    %c0_11 = arith.constant 0 : index
    %c24 = arith.constant 24 : index
    %26 = vector.load %arg1[%c0_11, %c24] : memref<8x32xf32, #tpu.memory_space<vmem>>, vector<8x8xf32>
    %27 = vector.broadcast %25 : vector<8x1xf32> to vector<8x8xf32>
    %28 = arith.mulf %27, %26 : vector<8x8xf32>
    %29 = arith.addf %24, %28 : vector<8x8xf32>
    %c0_12 = arith.constant 0 : index
    %c24_13 = arith.constant 24 : index
    %30 = vector.load %arg1[%c0_12, %c24_13] : memref<8x32xf32, #tpu.memory_space<vmem>>, vector<8x8xf32>
    %cst_14 = arith.constant 7.500000e-01 : f32
    %31 = vector.broadcast %cst_14 : f32 to vector<8x8xf32>
    %32 = arith.mulf %29, %31 : vector<8x8xf32>
    %cst_15 = arith.constant 2.500000e-01 : f32
    %33 = vector.broadcast %cst_15 : f32 to vector<8x8xf32>
    %34 = arith.mulf %30, %33 : vector<8x8xf32>
    %35 = arith.subf %32, %34 : vector<8x8xf32>
    %c0_16 = arith.constant 0 : index
    %c0_17 = arith.constant 0 : index
    %36 = vector.load %arg4[%c0_16, %c0_17] : memref<8x8xf32, #tpu.memory_space<vmem>>, vector<8x8xf32>
    %cst_18 = arith.constant dense<0.000000e+00> : vector<8x8xf32>
    %37 = tpu.matmul %35, %36, %cst_18 {dimension_numbers = #tpu.dot_dimension_numbers<[1], [0], [0], [1], [0, 0, 1, 1], [], []>} : vector<8x8xf32>, vector<8x8xf32>, vector<8x8xf32> -> vector<8x8xf32>
    %c0_19 = arith.constant 0 : index
    %c0_20 = arith.constant 0 : index
    %38 = vector.load %arg5[%c0_19, %c0_20] : memref<1x8xf32, #tpu.memory_space<vmem>>, vector<1x8xf32>
    %39 = vector.broadcast %38 : vector<1x8xf32> to vector<8x8xf32>
    %40 = arith.addf %37, %39 : vector<8x8xf32>
    %c0_21 = arith.constant 0 : index
    %c0_22 = arith.constant 0 : index
    %41 = vector.load %arg6[%c0_21, %c0_22] : memref<8x8xf32, #tpu.memory_space<vmem>>, vector<8x8xf32>
    tpu.vector_store %arg6[%c0_21, %c0_22], %40 {strides = array<i32>} : memref<8x8xf32, #tpu.memory_space<vmem>>, vector<8x8xf32>,
    return
  }
  func.func @transform_0(%arg0: i32) -> (i32, i32) {
    %c0_i32 = arith.constant 0 : i32
    %c0_i32_0 = arith.constant 0 : i32
    return %arg0, %c0_i32 : i32, i32
  }
  func.func @transform_1(%arg0: i32) -> (i32, i32) {
    %c0_i32 = arith.constant 0 : i32
    %c0_i32_0 = arith.constant 0 : i32
    %c0_i32_1 = arith.constant 0 : i32
    return %c0_i32, %c0_i32_0 : i32, i32
  }
  func.func @transform_2(%arg0: i32) -> (i32, i32) {
    %c0_i32 = arith.constant 0 : i32
    %c0_i32_0 = arith.constant 0 : i32
    %c0_i32_1 = arith.constant 0 : i32
    return %c0_i32, %c0_i32_0 : i32, i32
  }
  func.func @transform_3(%arg0: i32) -> (i32, i32) {
    %c0_i32 = arith.constant 0 : i32
    %c0_i32_0 = arith.constant 0 : i32
    %c0_i32_1 = arith.constant 0 : i32
    return %c0_i32, %c0_i32_0 : i32, i32
  }
  func.func @transform_4(%arg0: i32) -> (i32, i32) {
    %c0_i32 = arith.constant 0 : i32
    %c0_i32_0 = arith.constant 0 : i32
    %c0_i32_1 = arith.constant 0 : i32
    return %c0_i32, %c0_i32_0 : i32, i32
  }
  func.func @transform_5(%arg0: i32) -> (i32, i32) {
    %c0_i32 = arith.constant 0 : i32
    %c0_i32_0 = arith.constant 0 : i32
    return %arg0, %c0_i32 : i32, i32
  }
}

</mosaic_0001>

<bundles_post_ra>
// kernel: tpu_custom_call.1
= control target key start
LH: loop header
LB: loop body
LE: loop exit
PB: predicated region body
PF: predicated region fallthrough
CT: control target
= control target key end

     0   :  { %v314_v1 = vmov 0.0   ;;  %vm315_vm0 = vmmov 0   ;;  %s381_s0 = inlined_call_operand.vmem [shape: f32[8,32], index: 0, kind: input, shape index: {}]   ;;  %s382_s1 = inlined_call_operand.vmem [shape: f32[32,4], index: 1, kind: input, shape index: {}]   ;;  %s383_s2 = inlined_call_operand.vmem [shape: f32[1,4], index: 2, kind: input, shape index: {}]   ;;  %s384_s3 = inlined_call_operand.vmem [shape: f32[8,8], index: 3, kind: input, shape index: {}]   ;;  %s385_s4 = inlined_call_operand.vmem [shape: f32[1,8], index: 4, kind: input, shape index: {}]   ;;  %s386_s5 = inlined_call_operand.hbm [shape: f32[8,8], index: 5, kind: output, shape index: {}]  }
   0x1   :  { %v25_v0 = vld [vmem:[%s382_s1 + $0x18] sm:$0xff]  ;;  %261 = vmatprep.subr.mxu0 %v314_v1  ;;  %v24_v2 = vld [vmem:[%s382_s1 + $0x10] sm:$0xff]  ;;  %269 = vmatprep.mubr.msk.f32.mxu0 %vm315_vm0, %v314_v1 }
   0x2   :  { %262 = vmatpush3.msra.mxu0 %v25_v0  ;;  %272 = vmatprep.subr.mxu1 %v314_v1 }
   0x3   :  { %10 = vsyncpa [#allocation3], 0  ;;  %263 = vmatprep.subr.mxu0 %v314_v1  ;;  %v23_v3 = vld [vmem:[%s382_s1 + $0x8] sm:$0xff]  ;;  %274 = vmatprep.mubr.msk.f32.mxu1 %vm315_vm0, %v314_v1  ;;  %v22_v4 = vld [vmem:[%s382_s1] sm:$0xff]  ;;  %vm33_vm1 = vcmask 261120   ;;  %v316_v6 = vmov 3  }
   0x4   :  { %264 = vmatpush3.msra.mxu0 %v24_v2  ;;  %v21_v5 = vld [vmem:[%s381_s0] sm:$0xff]  ;;  %289 = vset.pattern.permute.xlu1 %v316_v6  ;;  %v317_v7 = vmov 1   ;;  %v318_v14 = vmov 0   ;;  %v319_v15 = vmov 2   ;;  %s321_s30 = smov 104   ;;  %s322_s6 = smov 112  }
   0x5   :  { %265 = vmatprep.subr.mxu0 %v314_v1  ;;  %287 = vset.pattern.permute.xlu0 %v317_v7  ;;  %v250_v8 = vld [vmem:[%s383_s2] ss:$0 sm:$0xff]  ;;  %s320_s2 = smov 120   ;;  %v147_v23 = vmul.f32 0.25, %v21_v5  ;;  %vm161_vm3 = vcmask 64512   ;;  %s323_s8 = smov [#allocation2]  }
   0x6   :  { %266 = vmatpush3.msra.mxu0 %v23_v3  ;;  %v153_v18 = vld [vmem:[%s384_s3] sm:$0xff]  ;;  %s242_s9 = sshll.u32 %s323_s8, 4  ;;  %s243_s9 = int_to_ptr.vmem [resolvable:$true] %s242_s9 }
   0x7   :  { %267 = vmatprep.subr.mxu0 %v314_v1  ;;  %273 = vmatpush3.msra.mxu1 %v153_v18  ;;  %v252_v35 = vld [vmem:[%s385_s4] ss:$0 sm:$0xff]  ;;  %s292_s10 = scalar_lea.vmem %s243_s9, 128  ;;  %p297_p1 = scmp.lt.s32.totalorder %s243_s9, %s243_s9 }
   0x8   :  { %268 = vmatpush3.msra.mxu0 %v22_v4  ;;  %p293_p0 = scmp.ne.s32.totalorder %s243_s9, %s292_s10  ;;  %p298_p2 = scmp.lt.s32.totalorder %s292_s10, %s292_s10 }
   0x9   :  { %270 = vmatmul.mubr.msk.f32.vlgmr.msra.gmra.mxu0 %vm33_vm1, %v21_v5 }
   0xa   :  { %p299_p3 = por %p298_p2, %p297_p1 }
   0xc   :  { %p300_p4 = pnand %p299_p3, %p293_p0 }
  0xc9   :  { %v103_v9 = vpop.f32.mrf.mxu0 }
  0xca   :  { %v104_v10 = vadd.f32 %v250_v8, %v103_v9 }
  0xcb   :  { %v271_v11 = vpop.f32.mrf.mxu0 }
  0xcc   :  { %vm107_vm2 = vcmp.ge.f32.partialorder %v104_v10, 0.0  ;;  %v108_v12 = vmul.f32 0.1, %v104_v10 }
  0xce   :  { %v109_v13 = vsel %vm107_vm2, %v104_v10, %v108_v12 }
  0xcf   :  { %137 = vperm.xlu1 %289, %v109_v13   ;;  %117 = vperm.xlu0 %287, %v109_v13  }
  0xd3   :  { %290 = vset.pattern.permute.xlu1 %v318_v14  ;;  %288 = vset.pattern.permute.xlu0 %v319_v15 }
  0xd4   :  { %112 = vperm.xlu1 %290, %v109_v13   ;;  %127 = vperm.xlu0 %288, %v109_v13  }
  0xd8   :  { %291 = vset.pattern.permute.xlu0 %v316_v6 }
 0x14a   :  { %v118_v16 = vpop.permute.xlu0 %117  ;;  %v138_v19 = vpop.permute.xlu1 %137 }
 0x14b   :  { %v120_v17 = vmul.f32 %v118_v16, %v21_v5  ;;  %v140_v20 = vmul.f32 %v138_v19, %v21_v5 }
 0x14d   :  { %122 = vrot.lane.b32.xlu1 %v120_v17, %s320_s2 }
 0x14f   :  { %v128_v21 = vpop.permute.xlu0 %127  ;;  %v113_v24 = vpop.permute.xlu1 %112 }
 0x150   :  { %v130_v22 = vmul.f32 %v128_v21, %v21_v5  ;;  %v115_v26 = vmul.f32 %v113_v24, %v21_v5 }
 0x151   :  { %142 = vrot.lane.b32.xlu1 %v140_v20, %s321_s30 }
 0x152   :  { %132 = vrot.lane.b32.xlu0 %v130_v22, %s322_s6 }
 0x156   :  { %149 = vrot.lane.b32.xlu0 %v147_v23, %s321_s30 }
 0x1bf   :  { %v123_v25 = vpop.permute.xlu1 %122 }
 0x1c0   :  { %v125_v27 = vadd.f32 %v123_v25, %v115_v26 }
 0x1c3   :  { %v143_v30 = vpop.permute.xlu1 %142 }
 0x1c4   :  { %v133_v28 = vpop.permute.xlu0 %132 }
 0x1c5   :  { %v135_v29 = vadd.f32 %v133_v28, %v125_v27 }
 0x1c7   :  { %v145_v31 = vadd.f32 %v143_v30, %v135_v29 }
 0x1c8   :  { %v150_v32 = vpop.permute.xlu0 %149 }
 0x1c9   :  { %v146_v33 = vmul.f32 0.75, %v145_v31 }
 0x1cb   :  { %v152_v34 = vsub.f32 %v146_v33, %v150_v32 }
 0x1cd   :  { %275 = vmatmul.mubr.msk.f32.vlgmr.msra.gmra.mxu1 %vm161_vm3, %v152_v34 }
 0x28d   :  { %v231_v36 = vpop.f32.mrf.mxu1 }
 0x28e   :  { %v232_v37 = vadd.f32 %v252_v35, %v231_v36 }
 0x28f   :  { %v276_v38 = vpop.f32.mrf.mxu1 }
 0x290   :  { %235 = vst.msk [vmem:[#allocation2] sm:$0xff] %vm161_vm3, %v232_v37 }
 0x291   :  { %303 = shalt.err (!%p300_p4)
}
 0x292   :  { %245 = dma.vmem_to_hbm [thread:$0]  %s243_s9, 128, %s386_s5, [#allocation3]  }
 0x293   :  { %312 = dma.done.wait [#allocation3], 128  }
 0x294   :  { %313 = vsyncadd [#allocation3], 4294967168 }
 0x295   :  { %249 = vsyncpa [#allocation3], 1 }

</bundles_post_ra>
